<compile_context>
chip_gen: v5e
topology: v5e:2x2
jax: 0.10.0
libtpu: 0.0.40
codegen_flags: <defaults>
</compile_context>

<pallas_src>
import jax
import jax.numpy as jnp
from jax.experimental import pallas as pl
from jax.experimental.pallas import tpu as pltpu  # noqa: F401  (imported for TPU backend parity)

BATCH = 8
IN_SIZE = 1
HIDDEN = 100
OUT_SIZE = 1
HPAD = 128  # lane-dense padded hidden width


def mlp_kernel(x_ref, small_ref, big_ref, o_ref):
    # small_ref rows: 0 = w0 (input-layer weights as a (1,128) row, zero-padded)
    #                 1 = b0, 2 = b1, 3 = b2   (zero-padded biases)
    #                 4 = w3 (output-layer weights as a (1,128) row, zero-padded)
    #                 5 = b3 (only lane 0 nonzero); rows 6-7 unused padding
    x = x_ref[...]                      # (B, 1)
    s = small_ref[...]                  # (8, 128) — one f32 vreg
    w0 = s[0:1, :]
    b0 = s[1:2, :]
    b1 = s[2:3, :]
    b2 = s[3:4, :]
    w3 = s[4:5, :]
    b3 = s[5:6, :]

    # Layer 0 (K=1): outer product on the VPU; padded lanes stay exactly 0.
    h = jnp.tanh(x * w0 + b0)           # (B, 128)

    # Two real 128x128 matmuls on the MXU.  dropout(p=0) == identity.
    h = jnp.tanh(jnp.dot(h, big_ref[0], preferred_element_type=jnp.float32) + b1)
    h = jnp.tanh(jnp.dot(h, big_ref[1], preferred_element_type=jnp.float32) + b2)

    # Layer 3 (N=1): VPU multiply + cross-lane reduction instead of an N=1 matmul.
    res = jnp.sum(h * w3, axis=-1, keepdims=True)   # (B, 1)

    # Lane-dense (B, 128) unmasked store; only lane 0 carries the real output
    # (b3 is zero in every other lane).  The wrapper slices lane 0.
    o_ref[...] = res + b3


def pack_params(params):
    """Pack the 8 PyTorch-layout tensors into two lane-dense slabs (exact zero-padding)."""
    (w0, b0), (w1, b1), (w2, b2), (w3, b3) = params

    small = jnp.zeros((8, HPAD), jnp.float32)
    small = small.at[0, :HIDDEN].set(w0[0])        # (1,100) -> row 0
    small = small.at[1, :HIDDEN].set(b0[0])
    small = small.at[2, :HIDDEN].set(b1[0])
    small = small.at[3, :HIDDEN].set(b2[0])
    small = small.at[4, :HIDDEN].set(w3[:, 0])     # (100,1) column -> row 4
    small = small.at[5, 0].set(b3[0, 0])

    big = jnp.zeros((2, HPAD, HPAD), jnp.float32)
    big = big.at[0, :HIDDEN, :HIDDEN].set(w1)
    big = big.at[1, :HIDDEN, :HIDDEN].set(w2)
    return small, big


def mlp_forward(x, small, big):
    B = x.shape[0]

    def full_spec(shape):
        # Single grid point; each operand is one full block resident in VMEM.
        return pl.BlockSpec(shape, lambda: tuple(0 for _ in shape))

    # TODO(synk): for large batches, add a batch grid axis marked "parallel"
    # (keeping weights VMEM-resident via index_map -> (0, 0)) to use both v7x cores.
    out_padded = pl.pallas_call(
        mlp_kernel,
        out_shape=jax.ShapeDtypeStruct((B, HPAD), jnp.float32),
        grid=(),
        in_specs=[full_spec(x.shape), full_spec(small.shape), full_spec(big.shape)],
        out_specs=full_spec((B, HPAD)),
        cost_estimate=pl.CostEstimate(
            flops=2 * B * (HPAD + 2 * HPAD * HPAD + HPAD),
            transcendentals=3 * B * HPAD,
            bytes_accessed=4 * (x.size + small.size + big.size + B * HPAD),
        ),
    )(x, small, big)
    return out_padded[:, :OUT_SIZE]


def init_linear(key, fan_in, fan_out):
    # Matches torch.nn.Linear default init: U(-1/sqrt(fan_in), 1/sqrt(fan_in)).
    # Weights stored as (in_features, out_features) so x @ W == x @ W_torch.T.
    kw, kb = jax.random.split(key)
    bound = 1.0 / jnp.sqrt(jnp.float32(fan_in))
    w = jax.random.uniform(kw, (fan_in, fan_out), jnp.float32, -bound, bound)
    b = jax.random.uniform(kb, (1, fan_out), jnp.float32, -bound, bound)
    return w, b


def reference_forward(x, params):
    # Pure-JAX reference for correctness checking (unpadded, PyTorch semantics).
    (w0, b0), (w1, b1), (w2, b2), (w3, b3) = params
    h = jnp.tanh(x @ w0 + b0)
    h = jnp.tanh(h @ w1 + b1)
    h = jnp.tanh(h @ w2 + b2)
    return h @ w3 + b3


if __name__ == "__main__":
    key = jax.random.PRNGKey(0)
    kx, k0, k1, k2, k3 = jax.random.split(key, 5)

    x = jax.random.normal(kx, (BATCH, IN_SIZE), jnp.float32)
    params = (
        init_linear(k0, IN_SIZE, HIDDEN),
        init_linear(k1, HIDDEN, HIDDEN),
        init_linear(k2, HIDDEN, HIDDEN),
        init_linear(k3, HIDDEN, OUT_SIZE),
    )

    small, big = pack_params(params)
    out = jax.block_until_ready(mlp_forward(x, small, big))
    ref = reference_forward(x, params)

    assert out.shape == (BATCH, OUT_SIZE), out.shape
    assert jnp.allclose(out, ref, atol=1e-5, rtol=1e-5), (out, ref)
    print("KERNEL_OK")
</pallas_src>

<mosaic_0001>
module attributes {stable_mosaic.version = 11 : i64} {
  func.func @mlp_kernel(%arg0: memref<8x1xf32, #tpu.memory_space<vmem>>, %arg1: memref<8x128xf32, #tpu.memory_space<vmem>>, %arg2: memref<2x128x128xf32, #tpu.memory_space<vmem>>, %arg3: memref<8x128xf32, #tpu.memory_space<vmem>>) attributes {dimension_semantics = [], scalar_prefetch = 0 : i64, scratch_operands = 0 : i64, tpu.core_type = #tpu.core_type<tc>} {
    %c0 = arith.constant 0 : index
    %c0_0 = arith.constant 0 : index
    %0 = vector.load %arg0[%c0, %c0_0] : memref<8x1xf32, #tpu.memory_space<vmem>>, vector<8x1xf32>
    %c0_1 = arith.constant 0 : index
    %c0_2 = arith.constant 0 : index
    %1 = vector.load %arg1[%c0_1, %c0_2] : memref<8x128xf32, #tpu.memory_space<vmem>>, vector<8x128xf32>
    %2 = vector.extract_strided_slice %1 {offsets = [0, 0], sizes = [1, 128], strides = [1, 1]} : vector<8x128xf32> to vector<1x128xf32>
    %3 = vector.extract_strided_slice %1 {offsets = [1, 0], sizes = [1, 128], strides = [1, 1]} : vector<8x128xf32> to vector<1x128xf32>
    %4 = vector.extract_strided_slice %1 {offsets = [2, 0], sizes = [1, 128], strides = [1, 1]} : vector<8x128xf32> to vector<1x128xf32>
    %5 = vector.extract_strided_slice %1 {offsets = [3, 0], sizes = [1, 128], strides = [1, 1]} : vector<8x128xf32> to vector<1x128xf32>
    %6 = vector.extract_strided_slice %1 {offsets = [4, 0], sizes = [1, 128], strides = [1, 1]} : vector<8x128xf32> to vector<1x128xf32>
    %7 = vector.extract_strided_slice %1 {offsets = [5, 0], sizes = [1, 128], strides = [1, 1]} : vector<8x128xf32> to vector<1x128xf32>
    %8 = vector.broadcast %0 : vector<8x1xf32> to vector<8x128xf32>
    %9 = vector.broadcast %2 : vector<1x128xf32> to vector<8x128xf32>
    %10 = arith.mulf %8, %9 : vector<8x128xf32>
    %11 = vector.broadcast %3 : vector<1x128xf32> to vector<8x128xf32>
    %12 = arith.addf %10, %11 : vector<8x128xf32>
    %13 = math.tanh %12 : vector<8x128xf32>
    %c0_3 = arith.constant 0 : index
    %c0_4 = arith.constant 0 : index
    %c0_5 = arith.constant 0 : index
    %14 = vector.load %arg2[%c0_3, %c0_4, %c0_5] : memref<2x128x128xf32, #tpu.memory_space<vmem>>, vector<1x128x128xf32>
    %15 = vector.shape_cast %14 : vector<1x128x128xf32> to vector<128x128xf32>
    %cst = arith.constant dense<0.000000e+00> : vector<8x128xf32>
    %16 = tpu.matmul %13, %15, %cst {dimension_numbers = #tpu.dot_dimension_numbers<[1], [0], [0], [1], [0, 0, 1, 1], [], []>} : vector<8x128xf32>, vector<128x128xf32>, vector<8x128xf32> -> vector<8x128xf32>
    %17 = vector.broadcast %4 : vector<1x128xf32> to vector<8x128xf32>
    %18 = arith.addf %16, %17 : vector<8x128xf32>
    %19 = math.tanh %18 : vector<8x128xf32>
    %c1 = arith.constant 1 : index
    %c0_6 = arith.constant 0 : index
    %c0_7 = arith.constant 0 : index
    %20 = vector.load %arg2[%c1, %c0_6, %c0_7] : memref<2x128x128xf32, #tpu.memory_space<vmem>>, vector<1x128x128xf32>
    %21 = vector.shape_cast %20 : vector<1x128x128xf32> to vector<128x128xf32>
    %cst_8 = arith.constant dense<0.000000e+00> : vector<8x128xf32>
    %22 = tpu.matmul %19, %21, %cst_8 {dimension_numbers = #tpu.dot_dimension_numbers<[1], [0], [0], [1], [0, 0, 1, 1], [], []>} : vector<8x128xf32>, vector<128x128xf32>, vector<8x128xf32> -> vector<8x128xf32>
    %23 = vector.broadcast %5 : vector<1x128xf32> to vector<8x128xf32>
    %24 = arith.addf %22, %23 : vector<8x128xf32>
    %25 = math.tanh %24 : vector<8x128xf32>
    %26 = vector.broadcast %6 : vector<1x128xf32> to vector<8x128xf32>
    %27 = arith.mulf %25, %26 : vector<8x128xf32>
    %cst_9 = arith.constant dense<0.000000e+00> : vector<8xf32>
    %28 = vector.multi_reduction <add>, %27, %cst_9 [1] : vector<8x128xf32> to vector<8xf32>
    %29 = vector.shape_cast %28 : vector<8xf32> to vector<8x1xf32>
    %30 = vector.broadcast %29 : vector<8x1xf32> to vector<8x128xf32>
    %31 = vector.broadcast %7 : vector<1x128xf32> to vector<8x128xf32>
    %32 = arith.addf %30, %31 : vector<8x128xf32>
    %c0_10 = arith.constant 0 : index
    %c0_11 = arith.constant 0 : index
    %33 = vector.load %arg3[%c0_10, %c0_11] : memref<8x128xf32, #tpu.memory_space<vmem>>, vector<8x128xf32>
    tpu.vector_store %arg3[%c0_10, %c0_11], %32 {strides = array<i32>} : memref<8x128xf32, #tpu.memory_space<vmem>>, vector<8x128xf32>,
    return
  }
}

</mosaic_0001>

<bundles_post_ra>
// kernel: tpu_custom_call.1
= control target key start
LH: loop header
LB: loop body
LE: loop exit
PB: predicated region body
PF: predicated region fallthrough
CT: control target
= control target key end

     0   :  { %8 = vsyncpa [#allocation3], 0  ;;  %s245_s0 = inlined_call_operand.vmem [shape: f32[8,1], index: 0, kind: input, shape index: {}]   ;;  %s246_s1 = inlined_call_operand.vmem [shape: f32[8,128], index: 1, kind: input, shape index: {}]   ;;  %s247_s2 = inlined_call_operand.hbm [shape: f32[2,128,128], index: 2, kind: input, shape index: {}]   ;;  %s248_s3 = inlined_call_operand.hbm [shape: f32[8,128], index: 3, kind: output, shape index: {}]  }
   0x1   :  { %9 = vsyncpa [#allocation4], 0  ;;  %s18_s14 = sshll.u32 %s247_s2, 4  ;;  %s208_s15 = smov [#allocation2]   ;;  %s19_s14 = int_to_ptr.hbm [resolvable:$true] %s18_s14 }
   0x2   :  { %s20_s16 = sshll.u32 %s208_s15, 4  ;;  %s209_s17 = smov 128   ;;  %s21_s16 = int_to_ptr.vmem [resolvable:$true] %s20_s16 }
   0x3   :  { %s210_s18 = smov 8  }
   0x4   :  { %26 = dma.hbm_to_vmem [thread:$0]  %s19_s14, 4096, %s21_s16, [#allocation3], %s209_s17, %s209_s17, %s210_s18  }
   0x5   :  { %204 = dma.done.wait [#allocation3], 4096  }
   0x6   :  { %205 = vsyncadd [#allocation3], 4294963200  ;;  %v211_v0 = vmov 0   ;;  %v31_v1 = vld [vmem:[%s245_s0] sm:$0xff]  ;;  %v58_v2 = vld [vmem:[#allocation2 + $0x78] sm:$0xff]  ;;  %s134_s24 = sshll.u32 %s248_s3, 4  ;;  %s135_s24 = int_to_ptr.hbm [resolvable:$true] %s134_s24 }
   0x7   :  { %149 = vset.pattern.permute.xlu0 %v211_v0  ;;  %v57_v3 = vld [vmem:[#allocation2 + $0x70] sm:$0xff]  ;;  %60 = vmatpush.msra.mxu0 %v58_v2  ;;  %v56_v4 = vld [vmem:[#allocation2 + $0x68] sm:$0xff]  ;;  %v55_v5 = vld [vmem:[#allocation2 + $0x60] sm:$0xff] }
   0x8   :  { %35 = vperm.xlu0 %149, %v31_v1   ;;  %v54_v6 = vld [vmem:[#allocation2 + $0x58] sm:$0xff]  ;;  %v53_v7 = vld [vmem:[#allocation2 + $0x50] sm:$0xff]  ;;  %v52_v8 = vld [vmem:[#allocation2 + $0x48] sm:$0xff] }
   0x9   :  { %61 = vmatpush.msra.mxu0 %v57_v3  ;;  %v51_v9 = vld [vmem:[#allocation2 + $0x40] sm:$0xff]  ;;  %v50_v10 = vld [vmem:[#allocation2 + $0x38] sm:$0xff]  ;;  %v49_v11 = vld [vmem:[#allocation2 + $0x30] sm:$0xff] }
   0xa   :  { %v48_v12 = vld [vmem:[#allocation2 + $0x28] sm:$0xff]  ;;  %v47_v13 = vld [vmem:[#allocation2 + $0x20] sm:$0xff]  ;;  %v46_v14 = vld [vmem:[#allocation2 + $0x18] sm:$0xff] }
   0xb   :  { %62 = vmatpush.msra.mxu0 %v56_v4  ;;  %v45_v15 = vld [vmem:[#allocation2 + $0x10] sm:$0xff]  ;;  %v44_v16 = vld [vmem:[#allocation2 + $0x8] sm:$0xff]  ;;  %v43_v17 = vld [vmem:[#allocation2] sm:$0xff] }
   0xc   :  { %v97_v18 = vld [vmem:[#allocation2 + $0xf8] sm:$0xff]  ;;  %v96_v19 = vld [vmem:[#allocation2 + $0xf0] sm:$0xff]  ;;  %v95_v20 = vld [vmem:[#allocation2 + $0xe8] sm:$0xff] }
   0xd   :  { %63 = vmatpush.msra.mxu0 %v55_v5  ;;  %99 = vmatpush.msra.mxu1 %v97_v18  ;;  %v94_v21 = vld [vmem:[#allocation2 + $0xe0] sm:$0xff]  ;;  %v93_v22 = vld [vmem:[#allocation2 + $0xd8] sm:$0xff]  ;;  %v92_v23 = vld [vmem:[#allocation2 + $0xd0] sm:$0xff] }
   0xe   :  { %v91_v24 = vld [vmem:[#allocation2 + $0xc8] sm:$0xff]  ;;  %v90_v25 = vld [vmem:[#allocation2 + $0xc0] sm:$0xff]  ;;  %v89_v27 = vld [vmem:[#allocation2 + $0xb8] sm:$0xff] }
   0xf   :  { %64 = vmatpush.msra.mxu0 %v54_v6  ;;  %100 = vmatpush.msra.mxu1 %v96_v19  ;;  %v32_v26 = vld [vmem:[%s246_s1] sm:$0xff]  ;;  %v88_v28 = vld [vmem:[#allocation2 + $0xb0] sm:$0xff]  ;;  %v87_v30 = vld [vmem:[#allocation2 + $0xa8] sm:$0xff]  ;;  %s212_s1 = smov [#allocation5]  }
  0x10   :  { %v38_v29 = vperm.slane %v32_v26, 0  ;;  %v40_v31 = vperm.slane %v32_v26, 1  ;;  %v86_v36 = vld [vmem:[#allocation2 + $0xa0] sm:$0xff]  ;;  %v85_v37 = vld [vmem:[#allocation2 + $0x98] sm:$0xff]  ;;  %v84_v38 = vld [vmem:[#allocation2 + $0x90] sm:$0xff]  ;;  %v59_v41 = vperm.slane %v32_v26, 2 }
  0x11   :  { %65 = vmatpush.msra.mxu0 %v53_v7  ;;  %101 = vmatpush.msra.mxu1 %v95_v20  ;;  %v83_v39 = vld [vmem:[#allocation2 + $0x88] sm:$0xff]  ;;  %v82_v40 = vld [vmem:[#allocation2 + $0x80] sm:$0xff]  ;;  %v98_v45 = vperm.slane %v32_v26, 3  ;;  %v120_v48 = vperm.slane %v32_v26, 4  ;;  %v124_v51 = vperm.slane %v32_v26, 5  ;;  %s132_s21 = sshll.u32 %s212_s1, 4  ;;  %s133_s21 = int_to_ptr.vmem [resolvable:$true] %s132_s21 }
  0x13   :  { %66 = vmatpush.msra.mxu0 %v52_v8  ;;  %102 = vmatpush.msra.mxu1 %v94_v21 }
  0x15   :  { %67 = vmatpush.msra.mxu0 %v51_v9  ;;  %103 = vmatpush.msra.mxu1 %v93_v22 }
  0x17   :  { %68 = vmatpush.msra.mxu0 %v50_v10  ;;  %104 = vmatpush.msra.mxu1 %v92_v23 }
  0x19   :  { %69 = vmatpush.msra.mxu0 %v49_v11  ;;  %105 = vmatpush.msra.mxu1 %v91_v24 }
  0x1b   :  { %70 = vmatpush.msra.mxu0 %v48_v12  ;;  %106 = vmatpush.msra.mxu1 %v90_v25 }
  0x1d   :  { %71 = vmatpush.msra.mxu0 %v47_v13  ;;  %107 = vmatpush.msra.mxu1 %v89_v27 }
  0x1f   :  { %72 = vmatpush.msra.mxu0 %v46_v14  ;;  %108 = vmatpush.msra.mxu1 %v88_v28 }
  0x21   :  { %73 = vmatpush.msra.mxu0 %v45_v15  ;;  %109 = vmatpush.msra.mxu1 %v87_v30 }
  0x23   :  { %74 = vmatpush.msra.mxu0 %v44_v16  ;;  %110 = vmatpush.msra.mxu1 %v86_v36 }
  0x25   :  { %75 = vmatpush.msra.mxu0 %v43_v17  ;;  %111 = vmatpush.msra.mxu1 %v85_v37 }
  0x27   :  { %112 = vmatpush.msra.mxu1 %v84_v38 }
  0x29   :  { %113 = vmatpush.msra.mxu1 %v83_v39 }
  0x2b   :  { %114 = vmatpush.msra.mxu1 %v82_v40 }
  0x7a   :  { %v36_v32 = vpop.permute.xlu0 %35 }
  0x7b   :  { %v39_v33 = vmul.f32 %v38_v29, %v36_v32 }
  0x7d   :  { %v41_v34 = vadd.f32 %v40_v31, %v39_v33 }
  0x7f   :  { %150 = vtanh.f32 %v41_v34 }
  0x85   :  { %v151_v35 = vpop.eup %150 }
  0x86   :  { %76 = vmatmul.f32.vlgmr.msra.gmra.mxu0 %v151_v35 }
 0x103   :  { %v77_v42 = vpop.f32.mrf.mxu0 }
 0x104   :  { %v78_v43 = vadd.f32 %v77_v42, %v59_v41 }
 0x106   :  { %152 = vtanh.f32 %v78_v43 }
 0x10c   :  { %v153_v44 = vpop.eup %152 }
 0x10d   :  { %115 = vmatmul.f32.vlgmr.msra.gmra.mxu1 %v153_v44 }
 0x18a   :  { %v116_v46 = vpop.f32.mrf.mxu1 }
 0x18b   :  { %v117_v47 = vadd.f32 %v116_v46, %v98_v45 }
 0x18d   :  { %154 = vtanh.f32 %v117_v47 }
 0x193   :  { %v155_v49 = vpop.eup %154 }
 0x194   :  { %v121_v50 = vmul.f32 %v155_v49, %v120_v48 }
 0x196   :  { %122 = vadd.xlane.f32.xlu0 %v121_v50 }
 0x209   :  { %v123_v52 = vpop.xlane.xlu0 %122 }
 0x20a   :  { %v125_v53 = vadd.f32 %v124_v51, %v123_v52 }
 0x20c   :  { %126 = vst [vmem:[#allocation5] sm:$0xff] %v125_v53 }
 0x20d   :  { %137 = dma.vmem_to_hbm [thread:$0]  %s133_s21, 128, %s135_s24, [#allocation4]  }
 0x20e   :  { %206 = dma.done.wait [#allocation4], 128  }
 0x20f   :  { %207 = vsyncadd [#allocation4], 4294967168 }
 0x210   :  { %142 = vsyncpa [#allocation3], 1 }
 0x211   :  { %143 = vsyncpa [#allocation4], 1 }

</bundles_post_ra>
